<compile_context>
chip_gen: v7x
topology: tpu7x:2x2x1
jax: 0.10.0
libtpu: 0.0.40
codegen_flags: <defaults>
</compile_context>

<pallas_src>
import jax
import jax.numpy as jnp
import numpy as np
from jax import lax
from jax.experimental import pallas as pl
from jax.experimental.pallas import tpu as pltpu

EPS = 1e-5
_LANE = 128


def _round_up(x, m):
    return ((x + m - 1) // m) * m


def episodic_actor_kernel(x_ref, w1t_ref, b1_ref, w2t_ref, b2_ref, out_ref):
    # x_ref:   (TB, D_in)  bf16   batch-major input tile (contiguous HBM rows)
    # w1t_ref: (H, D_in)   bf16
    # b1_ref:  (H, 1)      f32
    # w2t_ref: (A, H)      bf16
    # b2_ref:  (A, 1)      f32
    # out_ref: (A, TB)     f32    batch on the lane axis -> dense 128-lane stores
    x = x_ref[...]

    # hT = ReLU(W1 @ xT + b1): contract the feature axis (last axis of both
    # operands -- the standard q @ k^T MXU pattern).
    ht = lax.dot_general(
        w1t_ref[...], x, (((1,), (1,)), ((), ())),
        preferred_element_type=jnp.float32,
    ) + b1_ref[...]
    ht = jnp.maximum(ht, 0.0)

    # logitsT = W2 @ hT + b2
    logits = jnp.dot(
        w2t_ref[...], ht.astype(jnp.bfloat16),
        preferred_element_type=jnp.float32,
    ) + b2_ref[...]

    # softmax over the action axis (sublane axis 0), then + eps, all in f32.
    m = jnp.max(logits, axis=0, keepdims=True)
    e = jnp.exp(logits - m)
    denom = jnp.sum(e, axis=0, keepdims=True)
    out_ref[...] = e * pl.reciprocal(denom, approx=True) + EPS


def episodic_actor_forward(obs, w1, b1, w2, b2, *, tile_b=None):
    """obs: (B, D_in) f32; w1: (D_in, H); b1: (H,); w2: (H, A); b2: (A,).

    Weights are stored transposed w.r.t. torch's Linear (W[in, out]).
    Returns prob1 of shape (B, A) in float32.
    """
    B, D_in = obs.shape
    H = w1.shape[1]
    A = w2.shape[1]

    if tile_b is None:
        # ~512-row tiles reach >=85% of HBM roofline in the tiling sweep; keep
        # at least 2 grid steps when the batch allows so DMA pipelining and
        # v7x 2-TensorCore sharding have work to distribute.
        b128 = _round_up(B, _LANE)
        tile_b = min(512, max(_LANE, (b128 // 2) // _LANE * _LANE))
    assert tile_b % _LANE == 0, "tile_b must be a multiple of 128 (lane width)"

    B_pad = _round_up(B, tile_b)
    grid = (B_pad // tile_b,)

    # Wrapper-side layout plumbing (cheap; fuses with upstream ops in a real
    # model): pad the batch, stream matmul operands as bf16, transpose weights.
    obs_p = jnp.zeros((B_pad, D_in), jnp.bfloat16).at[:B].set(obs.astype(jnp.bfloat16))
    w1t = jnp.asarray(w1, jnp.bfloat16).T              # (H, D_in)
    w2t = jnp.asarray(w2, jnp.bfloat16).T              # (A, H)
    b1c = jnp.asarray(b1, jnp.float32).reshape(H, 1)   # (H, 1)
    b2c = jnp.asarray(b2, jnp.float32).reshape(A, 1)   # (A, 1)

    cost = pl.CostEstimate(
        flops=2 * B_pad * (D_in * H + H * A),
        transcendentals=B_pad * A,                     # exp
        bytes_accessed=(B_pad * D_in * 2               # obs (bf16)
                        + A * B_pad * 4                # out (f32)
                        + (H * D_in + A * H) * 2       # weights (bf16)
                        + (H + A) * 4),                # biases (f32)
    )

    out_t = pl.pallas_call(
        episodic_actor_kernel,
        out_shape=jax.ShapeDtypeStruct((A, B_pad), jnp.float32),
        grid_spec=pltpu.PrefetchScalarGridSpec(
            num_scalar_prefetch=0,
            grid=grid,
            in_specs=[
                pl.BlockSpec((tile_b, D_in), lambda i: (i, 0)),   # obs tile
                pl.BlockSpec((H, D_in), lambda i: (0, 0)),        # W1^T (resident)
                pl.BlockSpec((H, 1), lambda i: (0, 0)),           # b1
                pl.BlockSpec((A, H), lambda i: (0, 0)),           # W2^T (resident)
                pl.BlockSpec((A, 1), lambda i: (0, 0)),           # b2
            ],
            out_specs=pl.BlockSpec((A, tile_b), lambda i: (0, i)),
        ),
        compiler_params=pltpu.CompilerParams(
            dimension_semantics=("parallel",),
        ),
        cost_estimate=cost,
    )(obs_p, w1t, b1c, w2t, b2c)

    return out_t[:, :B].T                               # back to (B, A)


def reference_forward(obs, w1, b1, w2, b2):
    # Mirrors the kernel numerics: bf16 matmul operands, f32 accumulation,
    # f32 softmax, eps added after normalization.
    h = jnp.dot(obs.astype(jnp.bfloat16), jnp.asarray(w1, jnp.bfloat16),
                preferred_element_type=jnp.float32) + b1
    h = jnp.maximum(h, 0.0)
    logits = jnp.dot(h.astype(jnp.bfloat16), jnp.asarray(w2, jnp.bfloat16),
                     preferred_element_type=jnp.float32) + b2
    logits = logits - jnp.max(logits, axis=-1, keepdims=True)
    e = jnp.exp(logits)
    return e / jnp.sum(e, axis=-1, keepdims=True) + EPS


if __name__ == "__main__":
    # Small config consistent with the module's __init__:
    #   use_graph_feature=True, graph_output_size=32, sizes[-1]=32, branchs=16
    B = 200            # deliberately not a tile multiple: exercises batch padding
    D_IN = 32          # graph_output_size
    H = 32             # sizes[-1]
    BRANCHS = 16       # branchs

    key = jax.random.PRNGKey(0)
    k_obs, k_w1, k_b1, k_w2, k_b2 = jax.random.split(key, 5)

    obs = jax.random.normal(k_obs, (B, D_IN), dtype=jnp.float32)
    # torch Linear stores W[out, in]; here weights are stored as W[in, out].
    w1 = jax.random.normal(k_w1, (D_IN, H), dtype=jnp.float32) * 0.1
    b1 = jax.random.normal(k_b1, (H,), dtype=jnp.float32) * 0.1
    w2 = jax.random.normal(k_w2, (H, BRANCHS), dtype=jnp.float32) * 0.1
    b2 = jax.random.normal(k_b2, (BRANCHS,), dtype=jnp.float32) * 0.1

    fwd = jax.jit(episodic_actor_forward)
    prob1 = jax.block_until_ready(fwd(obs, w1, b1, w2, b2))
    assert prob1.shape == (B, BRANCHS)

    ref = reference_forward(obs, w1, b1, w2, b2)
    # Tolerance loosened vs. 1e-5 to account for the EUP approximate reciprocal.
    np.testing.assert_allclose(np.asarray(prob1), np.asarray(ref),
                               rtol=5e-3, atol=5e-4)

    print("KERNEL_OK")
</pallas_src>

<mosaic_0001>
module attributes {stable_mosaic.version = 11 : i64} {
  func.func @episodic_actor_kernel(%arg0: i32, %arg1: memref<128x32xbf16, #tpu.memory_space<vmem>>, %arg2: memref<32x32xbf16, #tpu.memory_space<vmem>>, %arg3: memref<32x1xf32, #tpu.memory_space<vmem>>, %arg4: memref<16x32xbf16, #tpu.memory_space<vmem>>, %arg5: memref<16x1xf32, #tpu.memory_space<vmem>>, %arg6: memref<16x128xf32, #tpu.memory_space<vmem>>) attributes {dimension_semantics = [#tpu.dimension_semantics<parallel>], iteration_bounds = array<i64: 2>, scalar_prefetch = 0 : i64, scratch_operands = 0 : i64, tpu.core_type = #tpu.core_type<tc>, window_params = [{transform_indices = @transform_0, window_bounds = array<i64: 128, 32>}, {pipeline_mode = #tpu.pipeline_mode<synchronous>, transform_indices = @transform_1, window_bounds = array<i64: 32, 32>}, {pipeline_mode = #tpu.pipeline_mode<synchronous>, transform_indices = @transform_2, window_bounds = array<i64: 32, 1>}, {pipeline_mode = #tpu.pipeline_mode<synchronous>, transform_indices = @transform_3, window_bounds = array<i64: 16, 32>}, {pipeline_mode = #tpu.pipeline_mode<synchronous>, transform_indices = @transform_4, window_bounds = array<i64: 16, 1>}, {transform_indices = @transform_5, window_bounds = array<i64: 16, 128>}]} {
    %c0 = arith.constant 0 : index
    %c0_0 = arith.constant 0 : index
    %0 = vector.load %arg1[%c0, %c0_0] : memref<128x32xbf16, #tpu.memory_space<vmem>>, vector<128x32xbf16>
    %c0_1 = arith.constant 0 : index
    %c0_2 = arith.constant 0 : index
    %1 = vector.load %arg2[%c0_1, %c0_2] : memref<32x32xbf16, #tpu.memory_space<vmem>>, vector<32x32xbf16>
    %cst = arith.constant dense<0.000000e+00> : vector<32x128xf32>
    %2 = tpu.matmul %1, %0, %cst {dimension_numbers = #tpu.dot_dimension_numbers<[1], [1], [0], [0], [0, 0, 1, 0], [], []>} : vector<32x32xbf16>, vector<128x32xbf16>, vector<32x128xf32> -> vector<32x128xf32>
    %c0_3 = arith.constant 0 : index
    %c0_4 = arith.constant 0 : index
    %3 = vector.load %arg3[%c0_3, %c0_4] : memref<32x1xf32, #tpu.memory_space<vmem>>, vector<32x1xf32>
    %4 = vector.broadcast %3 : vector<32x1xf32> to vector<32x128xf32>
    %5 = arith.addf %2, %4 : vector<32x128xf32>
    %cst_5 = arith.constant 0.000000e+00 : f32
    %6 = vector.broadcast %cst_5 : f32 to vector<32x128xf32>
    %7 = arith.maximumf %5, %6 : vector<32x128xf32>
    %c0_6 = arith.constant 0 : index
    %c0_7 = arith.constant 0 : index
    %8 = vector.load %arg4[%c0_6, %c0_7] : memref<16x32xbf16, #tpu.memory_space<vmem>>, vector<16x32xbf16>
    %9 = arith.truncf %7 : vector<32x128xf32> to vector<32x128xbf16>
    %cst_8 = arith.constant dense<0.000000e+00> : vector<16x128xf32>
    %10 = tpu.matmul %8, %9, %cst_8 {dimension_numbers = #tpu.dot_dimension_numbers<[1], [0], [0], [1], [0, 0, 1, 1], [], []>} : vector<16x32xbf16>, vector<32x128xbf16>, vector<16x128xf32> -> vector<16x128xf32>
    %c0_9 = arith.constant 0 : index
    %c0_10 = arith.constant 0 : index
    %11 = vector.load %arg5[%c0_9, %c0_10] : memref<16x1xf32, #tpu.memory_space<vmem>>, vector<16x1xf32>
    %12 = vector.broadcast %11 : vector<16x1xf32> to vector<16x128xf32>
    %13 = arith.addf %10, %12 : vector<16x128xf32>
    %cst_11 = arith.constant dense<0xFF800000> : vector<128xf32>
    %14 = vector.multi_reduction <maximumf>, %13, %cst_11 [0] : vector<16x128xf32> to vector<128xf32>
    %15 = vector.shape_cast %14 : vector<128xf32> to vector<1x128xf32>
    %16 = vector.broadcast %15 : vector<1x128xf32> to vector<16x128xf32>
    %17 = arith.subf %13, %16 : vector<16x128xf32>
    %18 = math.exp %17 : vector<16x128xf32>
    %cst_12 = arith.constant dense<0.000000e+00> : vector<128xf32>
    %19 = vector.multi_reduction <add>, %18, %cst_12 [0] : vector<16x128xf32> to vector<128xf32>
    %20 = vector.shape_cast %19 : vector<128xf32> to vector<1x128xf32>
    %21 = tpu.reciprocal %20 {approx = true} : vector<1x128xf32> -> vector<1x128xf32>
    %22 = vector.broadcast %21 : vector<1x128xf32> to vector<16x128xf32>
    %23 = arith.mulf %18, %22 : vector<16x128xf32>
    %cst_13 = arith.constant 9.99999974E-6 : f32
    %24 = vector.broadcast %cst_13 : f32 to vector<16x128xf32>
    %25 = arith.addf %23, %24 : vector<16x128xf32>
    %c0_14 = arith.constant 0 : index
    %c0_15 = arith.constant 0 : index
    %26 = vector.load %arg6[%c0_14, %c0_15] : memref<16x128xf32, #tpu.memory_space<vmem>>, vector<16x128xf32>
    tpu.vector_store %arg6[%c0_14, %c0_15], %25 {strides = array<i32>} : memref<16x128xf32, #tpu.memory_space<vmem>>, vector<16x128xf32>,
    return
  }
  func.func @transform_0(%arg0: i32) -> (i32, i32) {
    %c0_i32 = arith.constant 0 : i32
    %c0_i32_0 = arith.constant 0 : i32
    return %arg0, %c0_i32 : i32, i32
  }
  func.func @transform_1(%arg0: i32) -> (i32, i32) {
    %c0_i32 = arith.constant 0 : i32
    %c0_i32_0 = arith.constant 0 : i32
    %c0_i32_1 = arith.constant 0 : i32
    return %c0_i32, %c0_i32_0 : i32, i32
  }
  func.func @transform_2(%arg0: i32) -> (i32, i32) {
    %c0_i32 = arith.constant 0 : i32
    %c0_i32_0 = arith.constant 0 : i32
    %c0_i32_1 = arith.constant 0 : i32
    return %c0_i32, %c0_i32_0 : i32, i32
  }
  func.func @transform_3(%arg0: i32) -> (i32, i32) {
    %c0_i32 = arith.constant 0 : i32
    %c0_i32_0 = arith.constant 0 : i32
    %c0_i32_1 = arith.constant 0 : i32
    return %c0_i32, %c0_i32_0 : i32, i32
  }
  func.func @transform_4(%arg0: i32) -> (i32, i32) {
    %c0_i32 = arith.constant 0 : i32
    %c0_i32_0 = arith.constant 0 : i32
    %c0_i32_1 = arith.constant 0 : i32
    return %c0_i32, %c0_i32_0 : i32, i32
  }
  func.func @transform_5(%arg0: i32) -> (i32, i32) {
    %c0_i32 = arith.constant 0 : i32
    %c0_i32_0 = arith.constant 0 : i32
    return %c0_i32, %arg0 : i32, i32
  }
}

</mosaic_0001>

<bundles_post_ra>
// kernel: episodic_actor_forward.1
= control target key start
LH: loop header
LB: loop body
LE: loop exit
PB: predicated region body
PF: predicated region fallthrough
CT: control target
= control target key end

     0   :  { %s765_s18 = smov 0   ;;  %s767_s19 = smov 0   ;;  %s871_s0 = inlined_call_operand.vmem [shape: bf16[256,32], index: 0, kind: input, shape index: {}]   ;;  %s872_s1 = inlined_call_operand.vmem [shape: bf16[32,32], index: 1, kind: input, shape index: {}]   ;;  %s873_s2 = inlined_call_operand.vmem [shape: f32[32,1], index: 2, kind: input, shape index: {}]   ;;  %s874_s3 = inlined_call_operand.vmem [shape: bf16[16,32], index: 3, kind: input, shape index: {}]   ;;  %s875_s4 = inlined_call_operand.vmem [shape: f32[16,1], index: 4, kind: input, shape index: {}]   ;;  %s876_s5 = inlined_call_operand.vmem [shape: f32[16,256], index: 5, kind: output, shape index: {}]  }
   0x1   :  { %s769_s20 = smov 0  }
   0x2 LB: > { %s778_s21 = sadd.s32 4294967295, %s730_s20   ;;  %s780_s22 = sadd.s32 1, %s730_s20   ;;  %s730_s20 = sphi %s769_s20, %s880_s20   ;;  %s726_s19 = sphi %s767_s19, %s879_s19   ;;  %s722_s18 = sphi %s765_s18, %s878_s18  }
   0x3   : > { %s129_s23 = ssub.s32 %s730_s20, %s780_s22  ;;  %s132_s24 = sadd.s32 1, %s726_s19 }
   0x4   : > { %p130_p0 = scmp.eq.s32.totalorder %s129_s23, 0  ;;  %p142_p1 = scmp.ne.s32.totalorder %s726_s19, %s722_s18 }
   0x5   : > { %p143_p2 = scmp.eq.s32.totalorder %s778_s21, 1  ;;  %p591_p3 = scmp.ge.s32.totalorder %s730_s20, 1 }
   0x6   : > { %s788_s25 = scalar_select %p130_p0, %s726_s19, %s132_s24  }
   0x7   : > { %p790_p4 = por %p143_p2, %p142_p1  ;;  %p188_p5 = scmp.lt.s32.totalorder %s730_s20, 3 }
   0x9   : > { %p189_p6 = pnand %p591_p3, %p188_p5 }
   0xa   : > { %s593_s27 = sshll.u32 (!%p189_p6), %s778_s21, 4  ;;  %v699_v0 = vld [vmem:[%s872_s1] sm:$0xff] (!%p189_p6)   ;;  %vm316_vm0 = vcmask (!%p189_p6), 261120   ;;  %v244_v2 = vld [vmem:[%s873_s2 + $0x10] sm:$0xff] (!%p189_p6)  ;;  %v732_v3 = vmov (!%p189_p6), 0   ;;  %v243_v4 = vld [vmem:[%s873_s2 + $0x8] sm:$0xff] (!%p189_p6) }
   0xb   : > { %192 = sbr.rel (%p189_p6) target bundleno = 598 (0x256), region = 40  ;;  %p216_p7 = scmp.lt.s32.totalorder (!%p189_p6), %s593_s27, 31  ;;  %v242_v1 = vld [vmem:[%s873_s2] sm:$0xff] (!%p189_p6)  ;;  %642 = vmatprep.mubr.msk.bf16.mxu0 (!%p189_p6), %vm316_vm0, %v699_v0  ;;  %689 = vset.pattern.permute.xlu0 (!%p189_p6), %v732_v3  ;;  %v245_v5 = vld [vmem:[%s873_s2 + $0x18] sm:$0xff] (!%p189_p6)  ;;  %v405_v10 = vld [vmem:[%s875_s4 + $0x8] sm:$0xff] (!%p189_p6)  ;;  %v733_v25 = vmov (!%p189_p6), 0.0  }
   0xc   : > { %248 = vperm.xlu0 (!%p189_p6), %689, %v242_v1   ;;  %690 = vset.pattern.permute.xlu1 (!%p189_p6), %v732_v3  ;;  %v404_v9 = vld [vmem:[%s875_s4] sm:$0xff] (!%p189_p6)  ;;  %v700_v24 = vld [vmem:[%s872_s1 + $0x8] sm:$0xff] (!%p189_p6)   ;;  %vm734_vm1 = vmmov (!%p189_p6), 0   ;;  %s212_s6 = sand.u32 (!%p189_p6), 1, %s722_s18  }
   0xd   : > { %258 = vperm.xlu1 (!%p189_p6), %690, %v244_v2   ;;  %646 = vmatprep.subr.bf16.mxu1 (!%p189_p6), %v733_v25  ;;  %v701_v44 = vld [vmem:[%s874_s3] sm:$0xff] (!%p189_p6)   ;;  %s592_s7 = sshll.u32 (!%p189_p6), %s212_s6, 4 }
   0xe   : > { %650 = vmatprep.mubr.msk.bf16.mxu1 (!%p189_p6), %vm734_vm1, %v733_v25  ;;  %s214_s8 = scalar_lea.vmem (!%p189_p6), [#allocation2], %s592_s7 }
  0x10   : > { %253 = vperm.xlu0 (!%p189_p6), %689, %v243_v4  }
  0x11   : > { %263 = vperm.xlu1 (!%p189_p6), %690, %v245_v5  }
  0x12   : > { %s882_s27 = smov (!%p216_p7, %s593_s27), 31 }
  0x13   : > { %s594_s9 = sshll.u32 %s882_s27, 2 }
  0x14   : > { %s811_s14 = scalar_lea.vmem %s871_s0, %s594_s9  ;;  %408 = vperm.xlu0 %689, %v404_v9   ;;  %s610_s9 = sshll.u32 (%p790_p4), %s778_s21, 3 }
  0x15   : > { %v691_v6 = vld [vmem:[%s811_s14] sm:$0xff]   ;;  %v692_v7 = vld [vmem:[%s811_s14 + $0x8] sm:$0xff]   ;;  %413 = vperm.xlu1 %690, %v405_v10   ;;  %v693_v12 = vld [vmem:[%s811_s14 + $0x10] sm:$0xff]   ;;  %s500_s18 = scalar_lea.vmem (%p790_p4), %s876_s5, %s610_s9 }
  0x16   : > { %654 = vmatprep.subr.msk.bf16.mxu0 %vm316_vm0, %v691_v6  ;;  %v324_v8 = vsel %vm316_vm0, %v691_v6, 0  ;;  %v327_v11 = vsel %vm316_vm0, %v692_v7, 0  ;;  %v330_v13 = vsel %vm316_vm0, %v693_v12, 0  ;;  %v694_v14 = vld [vmem:[%s811_s14 + $0x18] sm:$0xff]   ;;  %v695_v16 = vld [vmem:[%s811_s14 + $0x20] sm:$0xff]   ;;  %v696_v18 = vld [vmem:[%s811_s14 + $0x28] sm:$0xff]  }
  0x17   : > { %627 = vmatpush3.bf16.xpose.msra.mxu0 %v324_v8  ;;  %v333_v15 = vsel %vm316_vm0, %v694_v14, 0  ;;  %v336_v17 = vsel %vm316_vm0, %v695_v16, 0  ;;  %v339_v19 = vsel %vm316_vm0, %v696_v18, 0  ;;  %v697_v20 = vld [vmem:[%s811_s14 + $0x30] sm:$0xff]   ;;  %v698_v22 = vld [vmem:[%s811_s14 + $0x38] sm:$0xff]  }
  0x18   : > { %655 = vmatprep.subr.msk.bf16.mxu0 %vm316_vm0, %v692_v7  ;;  %v342_v21 = vsel %vm316_vm0, %v697_v20, 0  ;;  %v345_v23 = vsel %vm316_vm0, %v698_v22, 0 }
  0x1f   : > { %629 = vmatpush3.bf16.xpose.msra.mxu0 %v327_v11 }
  0x20   : > { %656 = vmatprep.subr.msk.bf16.mxu0 %vm316_vm0, %v693_v12 }
  0x27   : > { %631 = vmatpush3.bf16.xpose.msra.mxu0 %v330_v13 }
  0x28   : > { %657 = vmatprep.subr.msk.bf16.mxu0 %vm316_vm0, %v694_v14 }
  0x2f   : > { %633 = vmatpush3.bf16.xpose.msra.mxu0 %v333_v15 }
  0x30   : > { %658 = vmatprep.subr.msk.bf16.mxu0 %vm316_vm0, %v695_v16 }
  0x37   : > { %635 = vmatpush3.bf16.xpose.msra.mxu0 %v336_v17 }
  0x38   : > { %659 = vmatprep.subr.msk.bf16.mxu0 %vm316_vm0, %v696_v18 }
  0x3f   : > { %637 = vmatpush3.bf16.xpose.msra.mxu0 %v339_v19 }
  0x40   : > { %660 = vmatprep.subr.msk.bf16.mxu0 %vm316_vm0, %v697_v20 }
  0x47   : > { %639 = vmatpush3.bf16.xpose.msra.mxu0 %v342_v21 }
  0x48   : > { %661 = vmatprep.subr.msk.bf16.mxu0 %vm316_vm0, %v698_v22 }
  0x4f   : > { %641 = vmatpush3.bf16.xpose.msra.mxu0 %v345_v23 }
  0x56   : > { %643 = vmatmul.mubr.msk.bf16.vlgmr.msra.gmra.mrb[0].mxu0 %vm316_vm0, %v700_v24 }
  0x8b   : > { %v249_v27 = vpop.permute.xlu0 %248 }
  0x8c   : > { %v259_v26 = vpop.permute.xlu1 %258 }
  0x8f   : > { %v254_v34 = vpop.permute.xlu0 %253 }
  0x90   : > { %v264_v31 = vpop.permute.xlu1 %263 }
  0x93   : > { %v409_v46 = vpop.permute.xlu0 %408 }
  0x94   : > { %v414_v48 = vpop.permute.xlu1 %413 }
 0x129   : > { %v644_v28 = vpop.f32.mrb[0].mxu0 }
 0x12a   : > { %v390_v29 = vadd.f32 %v644_v28, %v259_v26  ;;  %v381_v30 = vpop.f32.mrb[1].mxu0 }
 0x12b   : > { %v382_v32 = vadd.f32 %v381_v30, %v249_v27  ;;  %v645_v33 = vpop.f32.mrb[2].mxu0 }
 0x12c   : > { %v393_v35 = vadd.f32 %v645_v33, %v264_v31  ;;  %v384_v36 = vpop.f32.mrb[3].mxu0  ;;  %v398_v38 = vmax.f32 %v390_v29, 0.0 }
 0x12d   : > { %v385_v37 = vadd.f32 %v384_v36, %v254_v34  ;;  %v396_v40 = vmax.f32 %v382_v32, 0.0 }
 0x12e   : > { %v399_v39 = vmax.f32 %v393_v35, 0.0 }
 0x12f   : > { %v397_v41 = vmax.f32 %v385_v37, 0.0 }
 0x130   : > { %v403_v42 = vpack.c.bf16 %v399_v39, %v398_v38 }
 0x131   : > { %v402_v43 = vpack.c.bf16 %v397_v41, %v396_v40 }
 0x133   : > { %647 = vmatpush3.bf16.msra.mxu1 %v402_v43 }
 0x134   : > { %648 = vmatprep.subr.bf16.mxu1 %v733_v25 }
 0x137   : > { %649 = vmatpush3.bf16.msra.mxu1 %v403_v42 }
 0x13a   : > { %651 = vmatmul.mubr.msk.bf16.vlgmr.msra.gmra.mrb[0].mxu1 %vm316_vm0, %v701_v44 }
 0x20d   : > { %v458_v45 = vpop.f32.mrb[0].mxu1 }
 0x20e   : > { %v652_v47 = vpop.f32.mrb[1].mxu1  ;;  %v459_v50 = vadd.f32 %v458_v45, %v409_v46 }
 0x20f   : > { %v461_v49 = vpop.f32.mrb[2].mxu1 }
 0x210   : > { %v462_v51 = vadd.f32 %v461_v49, %v414_v48  ;;  %v653_v52 = vpop.f32.mrb[3].mxu1 }
 0x212   : > { %v465_v53 = vmax.f32 %v459_v50, %v462_v51 }
 0x214   : > { %v466_v54 = vrot.slane %v465_v53, 4 }
 0x216   : > { %v467_v55 = vmax.f32 %v465_v53, %v466_v54 }
 0x218   : > { %v468_v56 = vrot.slane %v467_v55, 2 }
 0x21a   : > { %v469_v57 = vmax.f32 %v467_v55, %v468_v56 }
 0x21c   : > { %v470_v58 = vrot.slane %v469_v57, 1 }
 0x21e   : > { %v471_v59 = vmax.f32 %v469_v57, %v470_v58 }
 0x220   : > { %v472_v60 = vsub.f32 %v459_v50, %v471_v59  ;;  %v473_v61 = vsub.f32 %v462_v51, %v471_v59 }
 0x222   : > { %v474_v62 = vmul.f32 1.442695, %v472_v60  ;;  %v476_v63 = vmul.f32 1.442695, %v473_v61 }
 0x224   : > { %702 = vpow2.f32 %v474_v62 }
 0x225   : > { %704 = vpow2.f32 %v476_v63 }
 0x22e   : > { %v703_v0 = vpop.eup %702 }
 0x22f   : > { %v705_v1 = vpop.eup %704 }
 0x230   : > { %v478_v2 = vadd.f32 %v705_v1, %v703_v0 }
 0x232   : > { %v479_v3 = vrot.slane %v478_v2, 4 }
 0x234   : > { %v480_v4 = vadd.f32 %v479_v3, %v478_v2 }
 0x236   : > { %v481_v5 = vrot.slane %v480_v4, 2 }
 0x238   : > { %v482_v6 = vadd.f32 %v481_v5, %v480_v4 }
 0x23a   : > { %v483_v7 = vrot.slane %v482_v6, 1 }
 0x23c   : > { %v484_v8 = vadd.f32 %v483_v7, %v482_v6 }
 0x23e   : > { %706 = vrcp.f32 %v484_v8 }
 0x247   : > { %498 = sbr.rel (!%p790_p4) target bundleno = 598 (0x256), region = 44 }
 0x248   : > { %v707_v9 = vpop.eup %706 }
 0x249   : > { %v486_v10 = vmul.f32 %v707_v9, %v703_v0  ;;  %v487_v11 = vmul.f32 %v707_v9, %v705_v1 }
 0x24b   : > { %v488_v12 = vadd.f32 1e-05, %v486_v10  ;;  %v489_v13 = vadd.f32 1e-05, %v487_v11 }
 0x24d   : > { %490 = vst [vmem:[%s214_s8] sm:$0xff] %v488_v12  ;;  %491 = vst [vmem:[%s214_s8 + $0x8] sm:$0xff] %v489_v13 }
 0x254   : > { %v530_v14 = vld [vmem:[%s214_s8] sm:$0xff]  ;;  %v532_v15 = vld [vmem:[%s214_s8 + $0x8] sm:$0xff] }
 0x255   : > { %531 = vst [vmem:[%s500_s18] sm:$0xff] %v530_v14  ;;  %533 = vst [vmem:[%s500_s18 + $0x10] sm:$0xff] %v532_v15 }
 0x256 PF: > { %p12_p8 = scmp.ge.s32.totalorder %s780_s22, 4   ;;  %s878_s18 = smov %s726_s19 }
 0x257   : > { %s879_s19 = smov %s788_s25  ;;  %s880_s20 = smov %s780_s22 }
 0x258   :  { %14 = sbr.rel (!%p12_p8) target bundleno = 2 (0x2), region = 108 }

</bundles_post_ra>
